<compile_context>
chip_gen: v6e
topology: v6e:2x2x1
jax: 0.10.0
libtpu: 0.0.40
codegen_flags: <defaults>
</compile_context>

<pallas_src>
import functools

import jax
import jax.numpy as jnp
from jax.experimental import pallas as pl
from jax.experimental.pallas import tpu as pltpu

EPS = 1e-5  # torch_geometric.nn.InstanceNorm default eps


# ---------------------------------------------------------------------------
# Kernels
# ---------------------------------------------------------------------------
def _layer1(f12_ref, w1_ref, b1_ref):
    # bf16 x bf16 -> f32 accumulation on the MXU
    return jnp.dot(f12_ref[...], w1_ref[...],
                   preferred_element_type=jnp.float32) + b1_ref[...]


def _bcast(oh, stat_ref):
    # broadcast per-graph [G, C] f32 stats to the tile's rows (small f32 matmul)
    return jnp.dot(oh, stat_ref[...], preferred_element_type=jnp.float32)


def stats1_kernel(f12_ref, oh_ref, oht_ref, w1_ref, b1_ref, mean1_ref, ssq1_ref):
    """Accumulate per-graph centered sum-of-squares of h1 = f12 @ W1 + b1."""
    @pl.when(pl.program_id(0) == 0)
    def _init():
        ssq1_ref[...] = jnp.zeros_like(ssq1_ref)

    h1 = _layer1(f12_ref, w1_ref, b1_ref)                 # [TE, 4H] f32
    hc = h1 - _bcast(oh_ref[...], mean1_ref)              # centered (mean via linearity)
    ssq1_ref[...] += jnp.dot(oht_ref[...], hc * hc,
                             preferred_element_type=jnp.float32)


def stats2_kernel(f12_ref, oh_ref, oht_ref, w1_ref, b1_ref, mean1_ref, rstd1_ref,
                  w2_ref, b2_ref, sum2_ref, ssq2_ref):
    """Accumulate per-graph sum / sum-of-squares of h2 = relu(IN(h1)) @ W2 + b2."""
    @pl.when(pl.program_id(0) == 0)
    def _init():
        sum2_ref[...] = jnp.zeros_like(sum2_ref)
        ssq2_ref[...] = jnp.zeros_like(ssq2_ref)

    oh = oh_ref[...]
    h1 = _layer1(f12_ref, w1_ref, b1_ref)
    n1 = jnp.maximum((h1 - _bcast(oh, mean1_ref)) * _bcast(oh, rstd1_ref), 0.0)
    h2 = jnp.dot(n1.astype(jnp.bfloat16), w2_ref[...],
                 preferred_element_type=jnp.float32) + b2_ref[...]        # [TE, H] f32
    oht = oht_ref[...]
    sum2_ref[...] += jnp.dot(oht, h2, preferred_element_type=jnp.float32)
    ssq2_ref[...] += jnp.dot(oht, h2 * h2, preferred_element_type=jnp.float32)


def output_kernel(f12_ref, oh_ref, w1_ref, b1_ref, mean1_ref, rstd1_ref,
                  w2_ref, b2_ref, mean2_ref, rstd2_ref, w3p_ref, b3_ref, out_ref):
    """Full forward for one row tile; lane-dense [8, TE] output (row 0 = result)."""
    oh = oh_ref[...]
    h1 = _layer1(f12_ref, w1_ref, b1_ref)
    n1 = jnp.maximum((h1 - _bcast(oh, mean1_ref)) * _bcast(oh, rstd1_ref), 0.0)
    h2 = jnp.dot(n1.astype(jnp.bfloat16), w2_ref[...],
                 preferred_element_type=jnp.float32) + b2_ref[...]
    n2 = jnp.maximum((h2 - _bcast(oh, mean2_ref)) * _bcast(oh, rstd2_ref), 0.0)
    # Final Linear(H -> 1) as an [8,H] x [TE,H]^T "NT" matmul (w3^T sits in row 0,
    # rows 1..7 are zero padding) so the result is a lane-dense [8, TE] store.
    out_t = jax.lax.dot_general(w3p_ref[...], n2, (((1,), (1,)), ((), ())),
                                preferred_element_type=jnp.float32)       # [8, TE]
    out_ref[...] = out_t + b3_ref[...]


# ---------------------------------------------------------------------------
# Tile-size / VMEM budgeting (generation-agnostic, v7x-safe)
# ---------------------------------------------------------------------------
def _per_tile_vmem_bytes(te, H, Gp):
    """Rough per-grid-step VMEM footprint."""
    streamed = te * (2 * H * 2 + Gp * 4 + Gp * 4) * 2     # f12(bf16), oh, ohT (x2 buffers)
    out_tile = 8 * te * 4 * 2                             # lane-dense output slab
    weights = (2 * H * 4 * H + 4 * H * H) * 2             # w1, w2 (bf16)
    weights += (4 * H + H + 8 * H + 1) * 4                # biases + padded w3 row
    stats = 6 * Gp * 4 * H * 4                            # per-graph stats / accumulators
    temps = te * (3 * 4 * H * 4 + 4 * H * 2 + 2 * H * 4)  # h1/hc/n1 f32, n1 bf16, h2/n2 f32
    return streamed + out_tile + weights + stats + temps


def _pick_tile(E, H, Gp, *, max_tile=1024, budget_bytes=20 * 1024 * 1024):
    """Largest row tile (multiple of 128) that fits a budget safe on all TPU gens
    (v7x has only 64 MiB physical VMEM, 32 MiB scoped default)."""
    te = min(max_tile, max(128, -(-E // 128) * 128))
    te = max(128, (te // 128) * 128)
    while te > 128 and _per_tile_vmem_bytes(te, H, Gp) > budget_bytes:
        te -= 128
    return te


def _vmem_limit_bytes(te, H, Gp):
    est = _per_tile_vmem_bytes(te, H, Gp)
    return int(min(max(32 << 20, 2 * est + (8 << 20)), 48 << 20))


# ---------------------------------------------------------------------------
# Forward wrapper
# ---------------------------------------------------------------------------
def extractor_mlp_forward(emb, edge_index, batch, params, num_graphs, *, max_tile=1024):
    """ExtractorMLP.forward (learn_edge_att=True), hot path inside Pallas."""
    # TODO(synk): training-mode Dropout(p) skipped (inference semantics).
    # TODO(synk): learn_edge_att=False branch (node-level MLP) not implemented.
    w1, b1, w2, b2, w3, b3 = params
    H = emb.shape[1]

    # ---- glue: gather + concat edge features, per-edge graph id -------------
    col, row = edge_index[0], edge_index[1]
    f12 = jnp.concatenate([emb[col], emb[row]], axis=-1).astype(jnp.float32)   # [E, 2H]
    eb = batch[col].astype(jnp.int32)                                          # [E]
    E = f12.shape[0]

    # ---- padding / tiling ----------------------------------------------------
    Gp = -(-num_graphs // 8) * 8                      # pad graph count to sublane multiple
    TE = _pick_tile(E, H, Gp, max_tile=max_tile)
    n_tiles = pl.cdiv(E, TE)
    Ep = n_tiles * TE
    pad = Ep - E

    f12_bf = jnp.pad(f12.astype(jnp.bfloat16), ((0, pad), (0, 0)))
    eb_pad = jnp.pad(eb, (0, pad), constant_values=Gp)   # out of range -> all-zero one-hot row

    # one-hot (broadcast per-graph stats to rows) + pre-built transpose (reductions)
    oh = (eb_pad[:, None] == jnp.arange(Gp)[None, :]).astype(jnp.float32)      # [Ep, Gp]
    oht = oh.T                                                                  # [Gp, Ep]

    cnt = jnp.clip(jnp.sum(oh, axis=0), 1.0, None)[:, None]                    # [Gp, 1]
    inv_cnt = 1.0 / cnt

    # bf16 copies of the big matmul operands; statistics stay f32.
    w1_bf = w1.astype(jnp.bfloat16)
    w2_bf = w2.astype(jnp.bfloat16)
    b1_f = b1.astype(jnp.float32)
    b2_f = b2.astype(jnp.float32)

    # Layer-1 mean via linearity: mean_g(f12 @ W1 + b1) = mean_g(f12) @ W1 + b1.
    mean_f12 = jax.ops.segment_sum(f12_bf[:E].astype(jnp.float32), eb,
                                   num_segments=Gp) * inv_cnt                  # [Gp, 2H]
    mean1 = mean_f12 @ w1_bf.astype(jnp.float32) + b1_f                        # [Gp, 4H]

    grid = (n_tiles,)
    vmem_limit = _vmem_limit_bytes(TE, H, Gp)

    def full(shape):
        return pl.BlockSpec(shape, lambda i: (0, 0))

    rows = lambda c: pl.BlockSpec((TE, c), lambda i: (i, 0))
    cols_t = pl.BlockSpec((Gp, TE), lambda i: (0, i))

    acc_params = pltpu.CompilerParams(dimension_semantics=("arbitrary",),
                                      vmem_limit_bytes=vmem_limit)
    par_params = pltpu.CompilerParams(dimension_semantics=("parallel",),
                                      vmem_limit_bytes=vmem_limit)

    # ---- pass 1: layer-1 centered sum-of-squares (accumulator output) -------
    ssq1 = pl.pallas_call(
        stats1_kernel,
        grid=grid,
        in_specs=[rows(2 * H), rows(Gp), cols_t,
                  full((2 * H, 4 * H)), full((1, 4 * H)), full((Gp, 4 * H))],
        out_specs=pl.BlockSpec((Gp, 4 * H), lambda i: (0, 0)),
        out_shape=jax.ShapeDtypeStruct((Gp, 4 * H), jnp.float32),
        compiler_params=acc_params,
    )(f12_bf, oh, oht, w1_bf, b1_f, mean1)
    rstd1 = jax.lax.rsqrt(ssq1 * inv_cnt + EPS)                                # [Gp, 4H]

    # ---- pass 2: layer-2 per-graph sum / sum-of-squares ----------------------
    sum2, ssq2 = pl.pallas_call(
        stats2_kernel,
        grid=grid,
        in_specs=[rows(2 * H), rows(Gp), cols_t,
                  full((2 * H, 4 * H)), full((1, 4 * H)), full((Gp, 4 * H)),
                  full((Gp, 4 * H)), full((4 * H, H)), full((1, H))],
        out_specs=(pl.BlockSpec((Gp, H), lambda i: (0, 0)),
                   pl.BlockSpec((Gp, H), lambda i: (0, 0))),
        out_shape=(jax.ShapeDtypeStruct((Gp, H), jnp.float32),
                   jax.ShapeDtypeStruct((Gp, H), jnp.float32)),
        compiler_params=acc_params,
    )(f12_bf, oh, oht, w1_bf, b1_f, mean1, rstd1, w2_bf, b2_f)
    mean2 = sum2 * inv_cnt
    # TODO(synk): layer-2 variance uses the uncentered E[x^2]-E[x]^2 form (f32);
    # layer-1 uses the exactly-centered form via mean linearity.
    var2 = jnp.maximum(ssq2 * inv_cnt - mean2 * mean2, 0.0)
    rstd2 = jax.lax.rsqrt(var2 + EPS)

    # ---- pass 3: full forward, lane-dense output ------------------------------
    w3_pad = jnp.zeros((8, H), jnp.float32).at[0].set(w3.astype(jnp.float32)[:, 0])
    b3r = b3.astype(jnp.float32).reshape(1, 1)
    out_flat = pl.pallas_call(
        output_kernel,
        grid=grid,
        in_specs=[rows(2 * H), rows(Gp),
                  full((2 * H, 4 * H)), full((1, 4 * H)), full((Gp, 4 * H)),
                  full((Gp, 4 * H)), full((4 * H, H)), full((1, H)),
                  full((Gp, H)), full((Gp, H)), full((8, H)), full((1, 1))],
        out_specs=pl.BlockSpec((8, TE), lambda i: (0, i)),
        out_shape=jax.ShapeDtypeStruct((8, Ep), jnp.float32),
        compiler_params=par_params,
    )(f12_bf, oh, w1_bf, b1_f, mean1, rstd1, w2_bf, b2_f, mean2, rstd2, w3_pad, b3r)

    return out_flat[0, :E][:, None]                          # [E, 1]


# ---------------------------------------------------------------------------
# References
# ---------------------------------------------------------------------------
def extractor_mlp_reference_f32(emb, edge_index, batch, params, num_graphs):
    """Pure-f32 JAX reference with exact PyTorch / PyG forward semantics."""
    w1, b1, w2, b2, w3, b3 = params
    col, row = edge_index[0], edge_index[1]
    f12 = jnp.concatenate([emb[col], emb[row]], axis=-1).astype(jnp.float32)
    eb = batch[col]

    def inorm(h):
        ones = jnp.ones((h.shape[0],), jnp.float32)
        cnt = jnp.clip(jax.ops.segment_sum(ones, eb, num_segments=num_graphs),
                       1.0, None)[:, None]
        mean = jax.ops.segment_sum(h, eb, num_segments=num_graphs) / cnt
        hc = h - mean[eb]
        var = jax.ops.segment_sum(hc * hc, eb, num_segments=num_graphs) / cnt
        return hc / jnp.sqrt(var[eb] + EPS)

    h = jnp.maximum(inorm(f12 @ w1 + b1), 0.0)
    h = jnp.maximum(inorm(h @ w2 + b2), 0.0)
    return h @ w3 + b3


def extractor_mlp_reference_mirrored(emb, edge_index, batch, params, num_graphs):
    """Reference mirroring the kernel's numerics (bf16 MXU operands, f32 stats,
    layer-1 mean via linearity, layer-2 uncentered variance)."""
    w1, b1, w2, b2, w3, b3 = params
    col, row = edge_index[0], edge_index[1]
    f12 = jnp.concatenate([emb[col], emb[row]], axis=-1).astype(jnp.float32)
    eb = batch[col]
    seg = functools.partial(jax.ops.segment_sum, segment_ids=eb,
                            num_segments=num_graphs)
    ones = jnp.ones((f12.shape[0],), jnp.float32)
    inv = 1.0 / jnp.clip(seg(ones), 1.0, None)[:, None]

    f12_q = f12.astype(jnp.bfloat16).astype(jnp.float32)
    w1_q = w1.astype(jnp.bfloat16).astype(jnp.float32)
    w2_q = w2.astype(jnp.bfloat16).astype(jnp.float32)

    mean1 = (seg(f12_q) * inv) @ w1_q + b1
    h1 = f12_q @ w1_q + b1
    hc1 = h1 - mean1[eb]
    rstd1 = jax.lax.rsqrt(seg(hc1 * hc1) * inv + EPS)
    n1 = jnp.maximum(hc1 * rstd1[eb], 0.0)

    n1_q = n1.astype(jnp.bfloat16).astype(jnp.float32)
    h2 = n1_q @ w2_q + b2
    mean2 = seg(h2) * inv
    var2 = jnp.maximum(seg(h2 * h2) * inv - mean2 * mean2, 0.0)
    rstd2 = jax.lax.rsqrt(var2 + EPS)
    n2 = jnp.maximum((h2 - mean2[eb]) * rstd2[eb], 0.0)
    return n2 @ w3 + b3


def init_params(key, hidden_size):
    """Deterministic synthetic weights for MLP([2H, 4H, H, 1])."""
    dims = [2 * hidden_size, 4 * hidden_size, hidden_size, 1]
    keys = jax.random.split(key, 6)
    params = []
    for i in range(3):
        fan_in, fan_out = dims[i], dims[i + 1]
        w = (jax.random.normal(keys[2 * i], (fan_in, fan_out), jnp.float32)
             * (1.0 / jnp.sqrt(fan_in)))
        b = jax.random.normal(keys[2 * i + 1], (1, fan_out), jnp.float32) * 0.01
        params += [w, b]
    return tuple(params)


if __name__ == "__main__":
    hidden_size = 32
    num_nodes = 24
    num_edges = 40
    num_graphs = 2

    key = jax.random.PRNGKey(0)
    k_emb, k_src, k_dst, k_par = jax.random.split(key, 4)

    emb = jax.random.normal(k_emb, (num_nodes, hidden_size), jnp.float32)
    # nodes 0..11 belong to graph 0, nodes 12..23 to graph 1
    batch = jnp.concatenate([jnp.zeros((12,), jnp.int32), jnp.ones((12,), jnp.int32)])
    # edges stay within their graph so batch[col] is well defined per graph
    src0 = jax.random.randint(k_src, (num_edges // 2,), 0, 12)
    dst0 = jax.random.randint(k_dst, (num_edges // 2,), 0, 12)
    src1 = jax.random.randint(k_src, (num_edges // 2,), 12, 24)
    dst1 = jax.random.randint(k_dst, (num_edges // 2,), 12, 24)
    edge_index = jnp.stack([jnp.concatenate([src0, src1]),
                            jnp.concatenate([dst0, dst1])]).astype(jnp.int32)  # [2, E]

    params = init_params(k_par, hidden_size)

    out = extractor_mlp_forward(emb, edge_index, batch, params, num_graphs)
    out = jax.block_until_ready(out)
    assert out.shape == (num_edges, 1), out.shape

    ref_m = extractor_mlp_reference_mirrored(emb, edge_index, batch, params, num_graphs)
    ref_f = extractor_mlp_reference_f32(emb, edge_index, batch, params, num_graphs)
    assert jnp.allclose(out, ref_m, rtol=5e-3, atol=5e-3), \
        f"mismatch vs mirrored reference (max abs diff {jnp.max(jnp.abs(out - ref_m))})"
    assert jnp.allclose(out, ref_f, rtol=1e-1, atol=1e-1), \
        f"mismatch vs f32 reference (max abs diff {jnp.max(jnp.abs(out - ref_f))})"

    print("KERNEL_OK")
</pallas_src>

<mosaic_0001>
module attributes {stable_mosaic.version = 11 : i64} {
  func.func @stats1_kernel(%arg0: i32, %arg1: memref<128x64xbf16, #tpu.memory_space<vmem>>, %arg2: memref<128x8xf32, #tpu.memory_space<vmem>>, %arg3: memref<8x128xf32, #tpu.memory_space<vmem>>, %arg4: memref<64x128xbf16, #tpu.memory_space<vmem>>, %arg5: memref<1x128xf32, #tpu.memory_space<vmem>>, %arg6: memref<8x128xf32, #tpu.memory_space<vmem>>, %arg7: memref<8x128xf32, #tpu.memory_space<vmem>>) attributes {dimension_semantics = [#tpu.dimension_semantics<arbitrary>], iteration_bounds = array<i64: 1>, scalar_prefetch = 0 : i64, scratch_operands = 0 : i64, tpu.core_type = #tpu.core_type<tc>, window_params = [{transform_indices = @transform_0, window_bounds = array<i64: 128, 64>}, {transform_indices = @transform_1, window_bounds = array<i64: 128, 8>}, {transform_indices = @transform_2, window_bounds = array<i64: 8, 128>}, {pipeline_mode = #tpu.pipeline_mode<synchronous>, transform_indices = @transform_3, window_bounds = array<i64: 64, 128>}, {pipeline_mode = #tpu.pipeline_mode<synchronous>, transform_indices = @transform_4, window_bounds = array<i64: 1, 128>}, {pipeline_mode = #tpu.pipeline_mode<synchronous>, transform_indices = @transform_5, window_bounds = array<i64: 8, 128>}, {pipeline_mode = #tpu.pipeline_mode<synchronous>, transform_indices = @transform_6, window_bounds = array<i64: 8, 128>}]} {
    %c0_i32 = arith.constant 0 : i32
    %0 = arith.cmpi eq, %arg0, %c0_i32 : i32
    %1 = arith.extui %0 : i1 to i32
    %c0_i32_0 = arith.constant 0 : i32
    %2 = arith.cmpi ne, %1, %c0_i32_0 : i32
    scf.if %2 {
      %cst_18 = arith.constant 0.000000e+00 : f32
      %19 = vector.broadcast %cst_18 : f32 to vector<8x128xf32>
      %c0_19 = arith.constant 0 : index
      %c0_20 = arith.constant 0 : index
      %20 = vector.load %arg7[%c0_19, %c0_20] : memref<8x128xf32, #tpu.memory_space<vmem>>, vector<8x128xf32>
      tpu.vector_store %arg7[%c0_19, %c0_20], %19 {strides = array<i32>} : memref<8x128xf32, #tpu.memory_space<vmem>>, vector<8x128xf32>,
    } else {
    }
    %c0 = arith.constant 0 : index
    %c0_1 = arith.constant 0 : index
    %3 = vector.load %arg1[%c0, %c0_1] : memref<128x64xbf16, #tpu.memory_space<vmem>>, vector<128x64xbf16>
    %c0_2 = arith.constant 0 : index
    %c0_3 = arith.constant 0 : index
    %4 = vector.load %arg4[%c0_2, %c0_3] : memref<64x128xbf16, #tpu.memory_space<vmem>>, vector<64x128xbf16>
    %cst = arith.constant dense<0.000000e+00> : vector<128x128xf32>
    %5 = tpu.matmul %3, %4, %cst {dimension_numbers = #tpu.dot_dimension_numbers<[1], [0], [0], [1], [0, 0, 1, 1], [], []>} : vector<128x64xbf16>, vector<64x128xbf16>, vector<128x128xf32> -> vector<128x128xf32>
    %c0_4 = arith.constant 0 : index
    %c0_5 = arith.constant 0 : index
    %6 = vector.load %arg5[%c0_4, %c0_5] : memref<1x128xf32, #tpu.memory_space<vmem>>, vector<1x128xf32>
    %7 = vector.broadcast %6 : vector<1x128xf32> to vector<128x128xf32>
    %8 = arith.addf %5, %7 : vector<128x128xf32>
    %c0_6 = arith.constant 0 : index
    %c0_7 = arith.constant 0 : index
    %9 = vector.load %arg2[%c0_6, %c0_7] : memref<128x8xf32, #tpu.memory_space<vmem>>, vector<128x8xf32>
    %c0_8 = arith.constant 0 : index
    %c0_9 = arith.constant 0 : index
    %10 = vector.load %arg6[%c0_8, %c0_9] : memref<8x128xf32, #tpu.memory_space<vmem>>, vector<8x128xf32>
    %cst_10 = arith.constant dense<0.000000e+00> : vector<128x128xf32>
    %11 = tpu.matmul %9, %10, %cst_10 {dimension_numbers = #tpu.dot_dimension_numbers<[1], [0], [0], [1], [0, 0, 1, 1], [], []>} : vector<128x8xf32>, vector<8x128xf32>, vector<128x128xf32> -> vector<128x128xf32>
    %12 = arith.subf %8, %11 : vector<128x128xf32>
    %c0_11 = arith.constant 0 : index
    %c0_12 = arith.constant 0 : index
    %13 = vector.load %arg7[%c0_11, %c0_12] : memref<8x128xf32, #tpu.memory_space<vmem>>, vector<8x128xf32>
    %c0_13 = arith.constant 0 : index
    %c0_14 = arith.constant 0 : index
    %14 = vector.load %arg3[%c0_13, %c0_14] : memref<8x128xf32, #tpu.memory_space<vmem>>, vector<8x128xf32>
    %15 = arith.mulf %12, %12 : vector<128x128xf32>
    %cst_15 = arith.constant dense<0.000000e+00> : vector<8x128xf32>
    %16 = tpu.matmul %14, %15, %cst_15 {dimension_numbers = #tpu.dot_dimension_numbers<[1], [0], [0], [1], [0, 0, 1, 1], [], []>} : vector<8x128xf32>, vector<128x128xf32>, vector<8x128xf32> -> vector<8x128xf32>
    %17 = arith.addf %13, %16 : vector<8x128xf32>
    %c0_16 = arith.constant 0 : index
    %c0_17 = arith.constant 0 : index
    %18 = vector.load %arg7[%c0_16, %c0_17] : memref<8x128xf32, #tpu.memory_space<vmem>>, vector<8x128xf32>
    tpu.vector_store %arg7[%c0_16, %c0_17], %17 {strides = array<i32>} : memref<8x128xf32, #tpu.memory_space<vmem>>, vector<8x128xf32>,
    return
  }
  func.func @transform_0(%arg0: i32) -> (i32, i32) {
    %c0_i32 = arith.constant 0 : i32
    %c0_i32_0 = arith.constant 0 : i32
    return %arg0, %c0_i32 : i32, i32
  }
  func.func @transform_1(%arg0: i32) -> (i32, i32) {
    %c0_i32 = arith.constant 0 : i32
    %c0_i32_0 = arith.constant 0 : i32
    return %arg0, %c0_i32 : i32, i32
  }
  func.func @transform_2(%arg0: i32) -> (i32, i32) {
    %c0_i32 = arith.constant 0 : i32
    %c0_i32_0 = arith.constant 0 : i32
    return %c0_i32, %arg0 : i32, i32
  }
  func.func @transform_3(%arg0: i32) -> (i32, i32) {
    %c0_i32 = arith.constant 0 : i32
    %c0_i32_0 = arith.constant 0 : i32
    %c0_i32_1 = arith.constant 0 : i32
    return %c0_i32, %c0_i32_0 : i32, i32
  }
  func.func @transform_4(%arg0: i32) -> (i32, i32) {
    %c0_i32 = arith.constant 0 : i32
    %c0_i32_0 = arith.constant 0 : i32
    %c0_i32_1 = arith.constant 0 : i32
    return %c0_i32, %c0_i32_0 : i32, i32
  }
  func.func @transform_5(%arg0: i32) -> (i32, i32) {
    %c0_i32 = arith.constant 0 : i32
    %c0_i32_0 = arith.constant 0 : i32
    %c0_i32_1 = arith.constant 0 : i32
    return %c0_i32, %c0_i32_0 : i32, i32
  }
  func.func @transform_6(%arg0: i32) -> (i32, i32) {
    %c0_i32 = arith.constant 0 : i32
    %c0_i32_0 = arith.constant 0 : i32
    %c0_i32_1 = arith.constant 0 : i32
    return %c0_i32, %c0_i32_0 : i32, i32
  }
}

</mosaic_0001>

<bundles_post_ra>
// kernel: tpu_custom_call.1
= control target key start
LH: loop header
LB: loop body
LE: loop exit
PB: predicated region body
PF: predicated region fallthrough
CT: control target
= control target key end

     0   :  { %vm264_vm0 = vcmask 64512   ;;  %vm125_vm1 = vcmask 523264   ;;  %s1009_s0 = inlined_call_operand.vmem [shape: bf16[128,64], index: 0, kind: input, shape index: {}]   ;;  %s1010_s1 = inlined_call_operand.vmem [shape: f32[128,8], index: 1, kind: input, shape index: {}]   ;;  %s1011_s2 = inlined_call_operand.vmem [shape: f32[8,128], index: 2, kind: input, shape index: {}]   ;;  %s1012_s3 = inlined_call_operand.vmem [shape: bf16[64,128], index: 3, kind: input, shape index: {}]   ;;  %s1013_s4 = inlined_call_operand.vmem [shape: f32[1,128], index: 4, kind: input, shape index: {}]   ;;  %s1014_s5 = inlined_call_operand.vmem [shape: f32[8,128], index: 5, kind: input, shape index: {}]   ;;  %s1015_s6 = inlined_call_operand.hbm [shape: f32[8,128], index: 6, kind: output, shape index: {}]  }
   0x1   :  { %v749_v0 = vld [vmem:[%s1012_s3 + $0x18] sm:$0xff]   ;;  %v750_v1 = vld [vmem:[%s1012_s3 + $0x10] sm:$0xff]   ;;  %v263_v2 = vld [vmem:[%s1014_s5] sm:$0xff] }
   0x2   :  { %661 = vmatprep.subr.bf16.mxu0 %v749_v0  ;;  %v247_v3 = vld [vmem:[%s1010_s1] sm:$0xff]  ;;  %v751_v4 = vld [vmem:[%s1012_s3 + $0x8] sm:$0xff]   ;;  %685 = vmatprep.subr.mxu1 %v263_v2  ;;  %v249_v7 = vld [vmem:[%s1010_s1 + $0x10] sm:$0xff] }
   0x3   :  { %662 = vmatpush3.bf16.msra.mxu0 %v749_v0  ;;  %v248_v5 = vld [vmem:[%s1010_s1 + $0x8] sm:$0xff]  ;;  %686 = vmatpush3.msra.mxu1 %v263_v2  ;;  %v753_v6 = vld [vmem:[%s1009_s0] sm:$0xff]   ;;  %v250_v9 = vld [vmem:[%s1010_s1 + $0x18] sm:$0xff] }
   0x4   :  { %663 = vmatprep.subr.bf16.mxu0 %v750_v1  ;;  %687 = vmatprep.mubr.msk.f32.mxu1 %vm264_vm0, %v247_v3  ;;  %v752_v8 = vld [vmem:[%s1012_s3] sm:$0xff]   ;;  %v252_v11 = vld [vmem:[%s1010_s1 + $0x28] sm:$0xff]  ;;  %v253_v12 = vld [vmem:[%s1010_s1 + $0x30] sm:$0xff] }
   0x5   :  { %688 = vmatmul.mubr.msk.f32.vlgmr.msra.gmra.mxu1 %vm264_vm0, %v248_v5  ;;  %669 = vmatprep.mubr.msk.bf16.mxu0 %vm125_vm1, %v753_v6  ;;  %v251_v10 = vld [vmem:[%s1010_s1 + $0x20] sm:$0xff]  ;;  %v754_v13 = vld [vmem:[%s1009_s0 + $0x8] sm:$0xff]   ;;  %v755_v14 = vld [vmem:[%s1009_s0 + $0x10] sm:$0xff]  }
   0x6   :  { %690 = vmatprep.mubr.msk.f32.mxu1 %vm264_vm0, %v249_v7  ;;  %v254_v15 = vld [vmem:[%s1010_s1 + $0x38] sm:$0xff]  ;;  %v255_v16 = vld [vmem:[%s1010_s1 + $0x40] sm:$0xff] }
   0x7   :  { %664 = vmatpush3.bf16.msra.mxu0 %v750_v1 }
   0x8   :  { %665 = vmatprep.subr.bf16.mxu0 %v751_v4 }
   0x9   :  { %691 = vmatmul.mubr.msk.f32.gmra.mxu1 %vm264_vm0, %v250_v9 }
   0xa   :  { %693 = vmatprep.mubr.msk.f32.mxu1 %vm264_vm0, %v251_v10 }
   0xb   :  { %666 = vmatpush3.bf16.msra.mxu0 %v751_v4 }
   0xc   :  { %667 = vmatprep.subr.bf16.mxu0 %v752_v8 }
   0xd   :  { %694 = vmatmul.mubr.msk.f32.gmra.mxu1 %vm264_vm0, %v252_v11 }
   0xe   :  { %696 = vmatprep.mubr.msk.f32.mxu1 %vm264_vm0, %v253_v12 }
   0xf   :  { %668 = vmatpush3.bf16.msra.mxu0 %v752_v8 }
  0x10   :  { %11 = vsyncpa [#allocation3], 0  ;;  %v256_v17 = vld [vmem:[%s1010_s1 + $0x48] sm:$0xff]  ;;  %v257_v18 = vld [vmem:[%s1010_s1 + $0x50] sm:$0xff]  ;;  %v783_v29 = vmov 0.0   ;;  %vm784_vm2 = vmmov 0  }
  0x11   :  { %697 = vmatmul.mubr.msk.f32.gmra.mxu1 %vm264_vm0, %v254_v15  ;;  %v756_v19 = vld [vmem:[%s1009_s0 + $0x18] sm:$0xff]   ;;  %v757_v20 = vld [vmem:[%s1009_s0 + $0x20] sm:$0xff]   ;;  %v260_v23 = vld [vmem:[%s1010_s1 + $0x68] sm:$0xff]  ;;  %711 = vmatprep.subr.mxu1 %v783_v29  ;;  %s785_s28 = smov [#allocation2]  }
  0x12   :  { %670 = vmatmul.mubr.msk.bf16.vlgmr.msra.gmra.mxu0 %vm125_vm1, %v754_v13  ;;  %699 = vmatprep.mubr.msk.f32.mxu1 %vm264_vm0, %v255_v16  ;;  %v258_v21 = vld [vmem:[%s1010_s1 + $0x58] sm:$0xff]  ;;  %v259_v22 = vld [vmem:[%s1010_s1 + $0x60] sm:$0xff]  ;;  %v261_v24 = vld [vmem:[%s1010_s1 + $0x70] sm:$0xff]  ;;  %s570_s29 = sshll.u32 %s785_s28, 4  ;;  %s571_s29 = int_to_ptr.vmem [resolvable:$true] %s570_s29 }
  0x13   :  { %673 = vmatprep.mubr.msk.bf16.mxu0 %vm125_vm1, %v755_v14  ;;  %v758_v25 = vld [vmem:[%s1009_s0 + $0x28] sm:$0xff]   ;;  %v759_v26 = vld [vmem:[%s1009_s0 + $0x30] sm:$0xff]   ;;  %v262_v27 = vld [vmem:[%s1010_s1 + $0x78] sm:$0xff]  ;;  %s761_s30 = scalar_lea.vmem %s571_s29, 128  ;;  %p766_p1 = scmp.lt.s32.totalorder %s571_s29, %s571_s29 }
  0x14   :  { %v760_v28 = vld [vmem:[%s1009_s0 + $0x38] sm:$0xff]   ;;  %v959_v58 = vld [vmem:[%s1013_s4] ss:$0 sm:$0xff]  ;;  %p762_p0 = scmp.ne.s32.totalorder %s571_s29, %s761_s30  ;;  %p767_p2 = scmp.lt.s32.totalorder %s761_s30, %s761_s30 }
  0x15   :  { %700 = vmatmul.mubr.msk.f32.gmra.mxu1 %vm264_vm0, %v256_v17 }
  0x16   :  { %702 = vmatprep.mubr.msk.f32.mxu1 %vm264_vm0, %v257_v18  ;;  %p768_p3 = por %p767_p2, %p766_p1 }
  0x18   :  { %p769_p4 = pnand %p768_p3, %p762_p0 }
  0x19   :  { %703 = vmatmul.mubr.msk.f32.gmra.mxu1 %vm264_vm0, %v258_v21 }
  0x1a   :  { %674 = vmatmul.mubr.msk.bf16.gmra.mxu0 %vm125_vm1, %v756_v19  ;;  %705 = vmatprep.mubr.msk.f32.mxu1 %vm264_vm0, %v259_v22 }
  0x1b   :  { %677 = vmatprep.mubr.msk.bf16.mxu0 %vm125_vm1, %v757_v20 }
  0x1d   :  { %706 = vmatmul.mubr.msk.f32.gmra.mxu1 %vm264_vm0, %v260_v23 }
  0x1e   :  { %708 = vmatprep.mubr.msk.f32.mxu1 %vm264_vm0, %v261_v24 }
  0x21   :  { %709 = vmatmul.mubr.msk.f32.gmra.mxu1 %vm264_vm0, %v262_v27 }
  0x22   :  { %678 = vmatmul.mubr.msk.bf16.gmra.mxu0 %vm125_vm1, %v758_v25  ;;  %743 = vmatprep.mubr.msk.f32.mxu1 %vm784_vm2, %v783_v29 }
  0x23   :  { %681 = vmatprep.mubr.msk.bf16.mxu0 %vm125_vm1, %v759_v26 }
  0x2a   :  { %682 = vmatmul.mubr.msk.bf16.gmra.mxu0 %vm125_vm1, %v760_v28 }
  0xc5   :  { %v934_v30 = vpop.f32.mrf.mxu1 }
  0xc7   :  { %v936_v31 = vpop.f32.mrf.mxu1 }
  0xc9   :  { %v938_v32 = vpop.f32.mrf.mxu1 }
  0xcb   :  { %v940_v33 = vpop.f32.mrf.mxu1 }
  0xcd   :  { %v942_v34 = vpop.f32.mrf.mxu1 }
  0xcf   :  { %v944_v35 = vpop.f32.mrf.mxu1 }
  0xd1   :  { %v698_v37 = vpop.f32.mrf.mxu1 }
  0xd2   :  { %v946_v36 = vpop.f32.mrf.mxu0 }
  0xd3   :  { %v950_v39 = vpop.f32.mrf.mxu1 }
  0xd4   :  { %v948_v38 = vpop.f32.mrf.mxu0 }
  0xd5   :  { %v701_v41 = vpop.f32.mrf.mxu1 }
  0xd6   :  { %v952_v40 = vpop.f32.mrf.mxu0 }
  0xd7   :  { %v419_v43 = vpop.f32.mrf.mxu1 }
  0xd8   :  { %v954_v42 = vpop.f32.mrf.mxu0 }
  0xd9   :  { %v704_v45 = vpop.f32.mrf.mxu1 }
  0xda   :  { %v675_v44 = vpop.f32.mrf.mxu0 }
  0xdb   :  { %v429_v48 = vpop.f32.mrf.mxu1  ;;  %v209_v20 = vadd.f32 %v675_v44, %v959_v58  ;;  %v193_v44 = vadd.f32 %v946_v36, %v959_v58 }
  0xdc   :  { %v200_v46 = vpop.f32.mrf.mxu0 }
  0xdd   :  { %v707_v51 = vpop.f32.mrf.mxu1  ;;  %v201_v26 = vadd.f32 %v959_v58, %v200_v46  ;;  %v464_v27 = vsub.f32 %v209_v20, %v950_v39  ;;  %v460_v36 = vsub.f32 %v193_v44, %v940_v33 }
  0xde   :  { %v676_v47 = vpop.f32.mrf.mxu0 }
  0xdf   :  { %v439_v54 = vpop.f32.mrf.mxu1  ;;  %v212_v17 = vadd.f32 %v676_v47, %v959_v58  ;;  %v482_v46 = vmul.f32 %v464_v27, %v464_v27 }
  0xe0   :  { %v203_v49 = vpop.f32.mrf.mxu0 }
  0xe1   :  { %v710_v57 = vpop.f32.mrf.mxu1  ;;  %v465_v23 = vsub.f32 %v212_v17, %v698_v37  ;;  %v204_v24 = vadd.f32 %v959_v58, %v203_v49 }
  0xe2   :  { %v679_v50 = vpop.f32.mrf.mxu0 }
  0xe3   :  { %v449_v61 = vpop.f32.mrf.mxu1  ;;  %v225_v8 = vadd.f32 %v679_v50, %v959_v58  ;;  %v463_v37 = vsub.f32 %v204_v24, %v942_v34  ;;  %v185_v34 = vadd.f32 %v959_v58, %v948_v38  ;;  %v475_v38 = vld [vmem:[%s1011_s2] sm:$0xff] }
  0xe4   :  { %v216_v52 = vpop.f32.mrf.mxu0 }
  0xe5   :  { %v217_v14 = vadd.f32 %v959_v58, %v216_v52  ;;  %v468_v15 = vsub.f32 %v225_v8, %v429_v48  ;;  %v481_v47 = vmul.f32 %v463_v37, %v463_v37 }
  0xe6   :  { %v680_v53 = vpop.f32.mrf.mxu0 }
  0xe7   :  { %v228_v5 = vadd.f32 %v680_v53, %v959_v58  ;;  %v466_v21 = vsub.f32 %v217_v14, %v419_v43  ;;  %v486_v22 = vmul.f32 %v468_v15, %v468_v15  ;;  %v483_v43 = vmul.f32 %v465_v23, %v465_v23 }
  0xe8   :  { %v219_v55 = vpop.f32.mrf.mxu0 }
  0xe9   :  { %v469_v11 = vsub.f32 %v228_v5, %v704_v45  ;;  %v220_v12 = vadd.f32 %v959_v58, %v219_v55  ;;  %v484_v28 = vmul.f32 %v466_v21, %v466_v21  ;;  %v462_v45 = vsub.f32 %v201_v26, %v944_v35 }
  0xea   :  { %v683_v56 = vpop.f32.mrf.mxu0 }
  0xeb   :  { %v241_v60 = vadd.f32 %v683_v56, %v959_v58  ;;  %v487_v18 = vmul.f32 %v469_v11, %v469_v11  ;;  %v467_v19 = vsub.f32 %v220_v12, %v701_v41  ;;  %v196_v41 = vadd.f32 %v952_v40, %v959_v58 }
  0xec   :  { %v232_v59 = vpop.f32.mrf.mxu0  ;;  %v188_v40 = vadd.f32 %v959_v58, %v954_v42  ;;  %v480_v48 = vmul.f32 %v462_v45, %v462_v45  ;;  %v478_v42 = vmul.f32 %v460_v36, %v460_v36 }
  0xed   :  { %v233_v1 = vadd.f32 %v959_v58, %v232_v59  ;;  %v472_v2 = vsub.f32 %v241_v60, %v449_v61  ;;  %v485_v25 = vmul.f32 %v467_v19, %v467_v19  ;;  %v461_v39 = vsub.f32 %v196_v41, %v938_v32 }
  0xee   :  { %v684_v62 = vpop.f32.mrf.mxu0  ;;  %v459_v49 = vsub.f32 %v188_v40, %v934_v30  ;;  %v458_v32 = vsub.f32 %v185_v34, %v936_v31 }
  0xef   :  { %v244_v63 = vadd.f32 %v684_v62, %v959_v58  ;;  %v470_v9 = vsub.f32 %v233_v1, %v439_v54  ;;  %v490_v10 = vmul.f32 %v472_v2, %v472_v2  ;;  %v479_v35 = vmul.f32 %v461_v39, %v461_v39 }
  0xf0   :  { %v235_v0 = vpop.f32.mrf.mxu0  ;;  %v477_v50 = vmul.f32 %v459_v49, %v459_v49  ;;  %v476_v33 = vmul.f32 %v458_v32, %v458_v32 }
  0xf1   :  { %v473_v3 = vsub.f32 %v244_v63, %v710_v57  ;;  %v236_v4 = vadd.f32 %v959_v58, %v235_v0  ;;  %v488_v16 = vmul.f32 %v470_v9, %v470_v9 }
  0xf3   :  { %v491_v6 = vmul.f32 %v473_v3, %v473_v3  ;;  %v471_v7 = vsub.f32 %v236_v4, %v707_v51 }
  0xf5   :  { %712 = vmatpush3.msra.mxu1 %v491_v6  ;;  %v489_v13 = vmul.f32 %v471_v7, %v471_v7 }
  0xf6   :  { %713 = vmatprep.subr.mxu1 %v783_v29 }
  0xf7   :  { %714 = vmatpush3.msra.mxu1 %v490_v10 }
  0xf8   :  { %715 = vmatprep.subr.mxu1 %v783_v29 }
  0xf9   :  { %716 = vmatpush3.msra.mxu1 %v489_v13 }
  0xfa   :  { %717 = vmatprep.subr.mxu1 %v783_v29 }
  0xfb   :  { %718 = vmatpush3.msra.mxu1 %v488_v16 }
  0xfc   :  { %719 = vmatprep.subr.mxu1 %v783_v29 }
  0xfd   :  { %720 = vmatpush3.msra.mxu1 %v487_v18 }
  0xfe   :  { %721 = vmatprep.subr.mxu1 %v783_v29 }
  0xff   :  { %722 = vmatpush3.msra.mxu1 %v486_v22 }
 0x100   :  { %723 = vmatprep.subr.mxu1 %v783_v29 }
 0x101   :  { %724 = vmatpush3.msra.mxu1 %v485_v25 }
 0x102   :  { %725 = vmatprep.subr.mxu1 %v783_v29 }
 0x103   :  { %726 = vmatpush3.msra.mxu1 %v484_v28 }
 0x104   :  { %727 = vmatprep.subr.mxu1 %v783_v29 }
 0x105   :  { %728 = vmatpush3.msra.mxu1 %v483_v43 }
 0x106   :  { %729 = vmatprep.subr.mxu1 %v783_v29 }
 0x107   :  { %730 = vmatpush3.msra.mxu1 %v482_v46 }
 0x108   :  { %731 = vmatprep.subr.mxu1 %v783_v29 }
 0x109   :  { %732 = vmatpush3.msra.mxu1 %v481_v47 }
 0x10a   :  { %733 = vmatprep.subr.mxu1 %v783_v29 }
 0x10b   :  { %734 = vmatpush3.msra.mxu1 %v480_v48 }
 0x10c   :  { %735 = vmatprep.subr.mxu1 %v783_v29 }
 0x10d   :  { %736 = vmatpush3.msra.mxu1 %v479_v35 }
 0x10e   :  { %737 = vmatprep.subr.mxu1 %v783_v29 }
 0x10f   :  { %738 = vmatpush3.msra.mxu1 %v478_v42 }
 0x110   :  { %739 = vmatprep.subr.mxu1 %v783_v29 }
 0x111   :  { %740 = vmatpush3.msra.mxu1 %v477_v50 }
 0x112   :  { %741 = vmatprep.subr.mxu1 %v783_v29 }
 0x113   :  { %742 = vmatpush3.msra.mxu1 %v476_v33 }
 0x114   :  { %744 = vmatmul.mubr.f32.vlgmr.msra.gmra.mxu1 %v475_v38 }
 0x1d4   :  { %v558_v30 = vpop.f32.mrf.mxu1 }
 0x1d5   :  { %563 = vst [vmem:[#allocation2] sm:$0xff] %v558_v30 }
 0x1d6   :  { %v745_v31 = vpop.f32.mrf.mxu1 }
 0x1d7   :  { %772 = shalt.err (!%p769_p4)
}
 0x1d8   :  { %573 = dma.vmem_to_hbm [thread:$0]  %s571_s29, 128, %s1015_s6, [#allocation3]  }
 0x1d9   :  { %781 = dma.done.wait [#allocation3], 128  }
 0x1da   :  { %782 = vsyncadd [#allocation3], 4294967168 }
 0x1db   :  { %577 = vsyncpa [#allocation3], 1 }

</bundles_post_ra>
